<compile_context>
chip_gen: v7x
topology: tpu7x:2x2x1
jax: 0.10.0
libtpu: 0.0.40
codegen_flags: <defaults>
</compile_context>

<pallas_src>
import functools

import jax
import jax.numpy as jnp
from jax.experimental import pallas as pl
from jax.experimental.pallas import tpu as pltpu


def _round_up(x, m):
    return ((x + m - 1) // m) * m


def _cdiv(a, b):
    return (a + b - 1) // b


def _vmem_capacity_bytes():
    try:
        return int(pltpu.get_tpu_info().vmem_capacity_bytes)
    except Exception:
        return 64 * 1024 * 1024  # conservative: v7x per-TC VMEM


# --------------------------------------------------------------------------
# Path A: K and N folded (full-D blocks).  One grid step per (tm, D) strip.
# --------------------------------------------------------------------------
def _fused_folded_kernel(x_ref, w_ref, b_ref, o_ref, *, mxu_dtype):
    x = x_ref[...]                       # (tm, D) — matmul operand AND residual
    xk = x if mxu_dtype is None else x.astype(mxu_dtype)
    acc = jnp.dot(xk, w_ref[...], preferred_element_type=jnp.float32)
    acc = acc + b_ref[...].astype(jnp.float32)
    acc = acc + x.astype(jnp.float32)    # residual add in f32
    o_ref[...] = acc.astype(o_ref.dtype)


# --------------------------------------------------------------------------
# Path B (fallback, very large D): canonical K-tiled matmul, f32 accumulator.
# --------------------------------------------------------------------------
def _fused_ktiled_kernel(x_ref, w_ref, b_ref, xres_ref, o_ref, acc_ref, *,
                         mxu_dtype):
    k = pl.program_id(2)

    @pl.when(k == 0)
    def _init():
        # Seed the accumulator with the broadcast bias (saves an epilogue add).
        acc_ref[...] = jnp.broadcast_to(
            b_ref[...].astype(jnp.float32), acc_ref.shape)

    xk = x_ref[...]
    if mxu_dtype is not None:
        xk = xk.astype(mxu_dtype)        # weight already cast in the wrapper
    acc_ref[...] += jnp.dot(xk, w_ref[...], preferred_element_type=jnp.float32)

    @pl.when(k == pl.num_programs(2) - 1)
    def _finalize():
        y = acc_ref[...] + xres_ref[...].astype(jnp.float32)
        o_ref[...] = y.astype(o_ref.dtype)


def residual_add_linear(x, w, b, *, mxu_dtype=None):
    """out = x @ w + b + x, fused in a single Pallas kernel.

    x: (B, N, D)   w: (D, D)   b: (D,)
    """
    B, N, D = x.shape
    M = B * N
    x2 = x.reshape(M, D)
    b2 = b.reshape(1, D)

    if mxu_dtype is not None:
        # Wrapper-side cast: halves weight HBM bytes (the binding roofline).
        w = w.astype(mxu_dtype)

    x_itemsize = jnp.dtype(x.dtype).itemsize
    w_itemsize = jnp.dtype(w.dtype).itemsize

    vmem_cap = _vmem_capacity_bytes()
    vmem_budget = min(vmem_cap // 2, 64 * 1024 * 1024)
    vmem_limit = int(max(32 * 1024 * 1024,
                         min(vmem_cap * 3 // 4, 100 * 1024 * 1024)))

    # ---------------- Path A tile selection -------------------------------
    def folded_footprint(tm):
        # x and out double-buffered; weight/bias have constant block indices
        # (DMA'd once) but still count both pipeline buffers.
        return (2 * tm * D * x_itemsize          # x (operand + residual)
                + 2 * tm * D * x_itemsize        # out
                + 2 * D * D * w_itemsize         # weight, resident
                + 2 * D * 4)                     # bias

    tm = min(512, _round_up(M, 8))
    if M > 8:
        # >= 2 M blocks so both TensorCores get work (v7x / megacore).
        tm = min(tm, _round_up(_cdiv(M, 2), 8))
    while tm > 8 and folded_footprint(tm) > vmem_budget:
        tm = max(8, _round_up(tm // 2, 8))

    use_folded = folded_footprint(tm) <= vmem_budget

    if use_folded:
        grid = (_cdiv(M, tm),)
        cost = pl.CostEstimate(
            flops=2 * M * D * D,
            transcendentals=0,
            bytes_accessed=(M * D * x_itemsize        # x read once
                            + D * D * w_itemsize      # weight read once
                            + D * 4                   # bias
                            + M * D * x_itemsize),    # output write
        )
        out2 = pl.pallas_call(
            functools.partial(_fused_folded_kernel, mxu_dtype=mxu_dtype),
            out_shape=jax.ShapeDtypeStruct((M, D), x.dtype),
            grid_spec=pltpu.PrefetchScalarGridSpec(
                num_scalar_prefetch=0,
                grid=grid,
                in_specs=[
                    pl.BlockSpec((tm, D), lambda i: (i, 0)),   # x (+ residual)
                    pl.BlockSpec((D, D), lambda i: (0, 0)),    # weight, resident
                    pl.BlockSpec((1, D), lambda i: (0, 0)),    # bias
                ],
                out_specs=pl.BlockSpec((tm, D), lambda i: (i, 0)),
            ),
            compiler_params=pltpu.CompilerParams(
                dimension_semantics=("parallel",),
                vmem_limit_bytes=vmem_limit,
            ),
            cost_estimate=cost,
        )(x2, w, b2)
        return out2.reshape(B, N, D)

    # ---------------- Path B: K-tiled fallback (very large D) -------------
    tm_b, tn, tk = 256, 512, 512
    Dp = _round_up(D, max(tn, tk))       # pad reduction/output cols only
    x2p = jnp.pad(x2, ((0, 0), (0, Dp - D)))
    wp = jnp.pad(w, ((0, Dp - D), (0, Dp - D)))
    bp = jnp.pad(b2, ((0, 0), (0, Dp - D)))

    n_m = _cdiv(M, tm_b)
    grid = (n_m, Dp // tn, Dp // tk)
    cost = pl.CostEstimate(
        flops=2 * M * Dp * Dp,
        transcendentals=0,
        bytes_accessed=(2 * M * Dp * x_itemsize          # x operand + residual
                        + n_m * Dp * Dp * w_itemsize     # weight per M block
                        + Dp * 4
                        + M * Dp * x_itemsize),
    )
    out2p = pl.pallas_call(
        functools.partial(_fused_ktiled_kernel, mxu_dtype=mxu_dtype),
        out_shape=jax.ShapeDtypeStruct((M, Dp), x.dtype),
        grid_spec=pltpu.PrefetchScalarGridSpec(
            num_scalar_prefetch=0,
            grid=grid,
            in_specs=[
                pl.BlockSpec((tm_b, tk), lambda i, j, k: (i, k)),   # x
                pl.BlockSpec((tk, tn), lambda i, j, k: (k, j)),     # weight
                pl.BlockSpec((1, tn), lambda i, j, k: (0, j)),      # bias
                pl.BlockSpec((tm_b, tn), lambda i, j, k: (i, j)),   # residual
            ],
            out_specs=pl.BlockSpec((tm_b, tn), lambda i, j, k: (i, j)),
            scratch_shapes=[pltpu.VMEM((tm_b, tn), jnp.float32)],
        ),
        compiler_params=pltpu.CompilerParams(
            dimension_semantics=("parallel", "parallel", "arbitrary"),
            vmem_limit_bytes=vmem_limit,
        ),
        cost_estimate=cost,
    )(x2p, wp, bp, x2p)
    return out2p[:, :D].reshape(B, N, D)


if __name__ == "__main__":
    key = jax.random.PRNGKey(0)
    kx, kw, kb = jax.random.split(key, 3)

    # Small shapes implied by the module (batch=2, seq=8, hidden=32).
    B, N, D = 2, 8, 32
    x = jax.random.normal(kx, (B, N, D), dtype=jnp.float32)
    w = jax.random.normal(kw, (D, D), dtype=jnp.float32) * (1.0 / jnp.sqrt(D))
    b = jax.random.normal(kb, (D,), dtype=jnp.float32) * 0.01

    out = residual_add_linear(x, w, b)
    jax.block_until_ready(out)

    ref = jnp.einsum("bnd,de->bne", x, w,
                     precision=jax.lax.Precision.HIGHEST) + b + x
    assert out.shape == (B, N, D)
    assert jnp.allclose(out, ref, atol=1e-3, rtol=1e-3)

    # Larger, non-128-multiple feature dim: exercises the folded full-D path
    # with two M blocks (both TensorCores on v7x) and no padding anywhere.
    B2, N2, D2 = 2, 384, 320
    x_l = jax.random.normal(kx, (B2, N2, D2), dtype=jnp.float32)
    w_l = jax.random.normal(kw, (D2, D2), dtype=jnp.float32) * (1.0 / jnp.sqrt(D2))
    b_l = jax.random.normal(kb, (D2,), dtype=jnp.float32) * 0.01

    out_l = residual_add_linear(x_l, w_l, b_l)
    jax.block_until_ready(out_l)
    ref_l = jnp.einsum("bnd,de->bne", x_l, w_l,
                       precision=jax.lax.Precision.HIGHEST) + b_l + x_l
    assert jnp.allclose(out_l, ref_l, atol=1e-3, rtol=1e-3)

    # bf16 MXU fast path: weight cast in the wrapper (half the weight HBM
    # bytes), f32 accumulation, f32 residual/bias math.  Opt-in only.
    out_bf16 = residual_add_linear(x_l, w_l, b_l, mxu_dtype=jnp.bfloat16)
    jax.block_until_ready(out_bf16)
    assert jnp.allclose(out_bf16, ref_l, atol=1e-1, rtol=1e-1)

    # TODO(synk): the PyTorch module's `fn` is arbitrary; only the Linear
    # (matmul + bias) instantiation is fused with the residual add here.
    print("KERNEL_OK")
</pallas_src>

<mosaic_0001>
module attributes {stable_mosaic.version = 11 : i64} {
  func.func @_fused_folded_kernel(%arg0: i32, %arg1: memref<8x32xf32, #tpu.memory_space<vmem>>, %arg2: memref<32x32xf32, #tpu.memory_space<vmem>>, %arg3: memref<1x32xf32, #tpu.memory_space<vmem>>, %arg4: memref<8x32xf32, #tpu.memory_space<vmem>>) attributes {dimension_semantics = [#tpu.dimension_semantics<parallel>], iteration_bounds = array<i64: 2>, scalar_prefetch = 0 : i64, scratch_operands = 0 : i64, tpu.core_type = #tpu.core_type<tc>, window_params = [{transform_indices = @transform_0, window_bounds = array<i64: 8, 32>}, {pipeline_mode = #tpu.pipeline_mode<synchronous>, transform_indices = @transform_1, window_bounds = array<i64: 32, 32>}, {pipeline_mode = #tpu.pipeline_mode<synchronous>, transform_indices = @transform_2, window_bounds = array<i64: 1, 32>}, {transform_indices = @transform_3, window_bounds = array<i64: 8, 32>}]} {
    %c0 = arith.constant 0 : index
    %c0_0 = arith.constant 0 : index
    %0 = vector.load %arg1[%c0, %c0_0] : memref<8x32xf32, #tpu.memory_space<vmem>>, vector<8x32xf32>
    %c0_1 = arith.constant 0 : index
    %c0_2 = arith.constant 0 : index
    %1 = vector.load %arg2[%c0_1, %c0_2] : memref<32x32xf32, #tpu.memory_space<vmem>>, vector<32x32xf32>
    %cst = arith.constant dense<0.000000e+00> : vector<8x32xf32>
    %2 = tpu.matmul %0, %1, %cst {dimension_numbers = #tpu.dot_dimension_numbers<[1], [0], [0], [1], [0, 0, 1, 1], [], []>} : vector<8x32xf32>, vector<32x32xf32>, vector<8x32xf32> -> vector<8x32xf32>
    %c0_3 = arith.constant 0 : index
    %c0_4 = arith.constant 0 : index
    %3 = vector.load %arg3[%c0_3, %c0_4] : memref<1x32xf32, #tpu.memory_space<vmem>>, vector<1x32xf32>
    %4 = vector.broadcast %3 : vector<1x32xf32> to vector<8x32xf32>
    %5 = arith.addf %2, %4 : vector<8x32xf32>
    %6 = arith.addf %5, %0 : vector<8x32xf32>
    %c0_5 = arith.constant 0 : index
    %c0_6 = arith.constant 0 : index
    %7 = vector.load %arg4[%c0_5, %c0_6] : memref<8x32xf32, #tpu.memory_space<vmem>>, vector<8x32xf32>
    tpu.vector_store %arg4[%c0_5, %c0_6], %6 {strides = array<i32>} : memref<8x32xf32, #tpu.memory_space<vmem>>, vector<8x32xf32>,
    return
  }
  func.func @transform_0(%arg0: i32) -> (i32, i32) {
    %c0_i32 = arith.constant 0 : i32
    %c0_i32_0 = arith.constant 0 : i32
    return %arg0, %c0_i32 : i32, i32
  }
  func.func @transform_1(%arg0: i32) -> (i32, i32) {
    %c0_i32 = arith.constant 0 : i32
    %c0_i32_0 = arith.constant 0 : i32
    %c0_i32_1 = arith.constant 0 : i32
    return %c0_i32, %c0_i32_0 : i32, i32
  }
  func.func @transform_2(%arg0: i32) -> (i32, i32) {
    %c0_i32 = arith.constant 0 : i32
    %c0_i32_0 = arith.constant 0 : i32
    %c0_i32_1 = arith.constant 0 : i32
    return %c0_i32, %c0_i32_0 : i32, i32
  }
  func.func @transform_3(%arg0: i32) -> (i32, i32) {
    %c0_i32 = arith.constant 0 : i32
    %c0_i32_0 = arith.constant 0 : i32
    return %arg0, %c0_i32 : i32, i32
  }
}

</mosaic_0001>

<bundles_post_ra>
// kernel: tpu_custom_call.1
= control target key start
LH: loop header
LB: loop body
LE: loop exit
PB: predicated region body
PF: predicated region fallthrough
CT: control target
= control target key end

     0   :  { %8 = vsyncpa [#allocation3], 0  ;;  %s840_s0 = inlined_call_operand.hbm [shape: f32[16,32], index: 0, kind: input, shape index: {}]   ;;  %s841_s1 = inlined_call_operand.hbm [shape: f32[32,32], index: 1, kind: input, shape index: {}]   ;;  %s842_s2 = inlined_call_operand.vmem [shape: f32[1,32], index: 2, kind: input, shape index: {}]   ;;  %s843_s3 = inlined_call_operand.hbm [shape: f32[16,32], index: 3, kind: output, shape index: {}]  }
   0x1   :  { %10 = vsyncpa [#allocation3 + $0x1], 0 }
   0x2   :  { %11 = vsyncpa [#allocation6], 0 }
   0x3   :  { %12 = vsyncpa [#allocation4], 0 }
   0x4   :  { %14 = vsyncpa [#allocation4 + $0x1], 0  ;;  %s641_s12 = smov 0   ;;  %s643_s13 = smov 0  }
   0x5   :  { %s645_s14 = smov 0   ;;  %s647_s15 = smov 0  }
   0x6 LB: > { %s662_s16 = sadd.s32 4294967295, %s611_s15   ;;  %s383_s17 = sadd.s32 4294967294, %s611_s15   ;;  %s611_s15 = sphi %s647_s15, %s863_s15   ;;  %s607_s14 = sphi %s645_s14, %s862_s14   ;;  %s603_s13 = sphi %s643_s13, %s861_s13   ;;  %s599_s12 = sphi %s641_s12, %s860_s12  }
   0x7   : > { %p40_p0 = scmp.ne.s32.totalorder %s603_s13, %s599_s12  ;;  %p844_p1 = scmp.eq.s32.totalorder %s662_s16, 0 }
   0x8   : > { %p112_p3 = scmp.eq.s32.totalorder %s383_s17, 1  ;;  %p384_p5 = scmp.ge.s32.totalorder %s611_s15, 1 }
   0x9   : > { %p671_p4 = por %p844_p1, %p40_p0  ;;  %p119_p7 = scmp.lt.s32.totalorder %s611_s15, 3 }
   0xa   : > { %p676_p6 = por %p112_p3, %p40_p0  ;;  %s613_s21 = smov [#allocation5]  }
   0xb   : > { %s847_s18 = scalar_select %p671_p4, 1, 0 }
   0xc   : > { %s848_s19 = scalar_select %p676_p6, 1, 0 }
   0xd   : > { %p681_p8 = pnand %p384_p5, %p119_p7  ;;  %s131_s22 = sshll.u32 %s613_s21, 4  ;;  %s685_s22 = int_to_ptr.vmem [resolvable:$true] %s131_s22 }
   0xe   : > { %s697_s24 = sadd.s32 1, %s611_s15   ;;  %s27_s25 = sadd.s32 1, %s607_s14 }
   0xf   : > { %s849_s20 = scalar_select %p681_p8, 1, 0 }
  0x10   : > { %p429_p9 = pneg %p681_p8  ;;  %s24_s26 = ssub.s32 %s611_s15, %s697_s24 }
  0x11   : > { %s483_s29 = scalar_lea.hbm %s841_s1, 512 }
  0x12   : > { %p692_p11 = pnand %p429_p9, %p844_p1  ;;  %p484_p12 = scmp.ne.s32.totalorder %s841_s1, %s483_s29 }
  0x13   : > { %p490_p5 = scmp.lt.u32.totalorder %s483_s29, %s841_s1 }
  0x14   : > { %p485_p13 = pneg %p692_p11 }
  0x16   : > { %p486_p0 = pnand %p485_p13, %p484_p12 }
  0x18   : > { %p487_p3 = pneg %p486_p0 }
  0x1a   : > { %p492_p7 = pnand %p490_p5, %p487_p3 }
  0x1c   : > { %495 = shalt.err (!%p492_p7)
}
  0x1d   : > { %s496_s7 = scalar_lea.vmem %s685_s22, 512  ;;  %p504_p2 = scmp.lt.s32.totalorder %s685_s22, %s685_s22 }
  0x1e   : > { %p497_p9 = scmp.ne.s32.totalorder %s685_s22, %s496_s7  ;;  %p505_p6 = scmp.lt.s32.totalorder %s496_s7, %s496_s7 }
  0x20   : > { %p499_p10 = pnand %p497_p9, %p485_p13  ;;  %p506_p4 = por %p505_p6, %p504_p2 }
  0x22   : > { %p500_p1 = pneg %p499_p10 }
  0x24   : > { %p507_p8 = pnand %p506_p4, %p500_p1 }
  0x26   : > { %510 = shalt.err (!%p507_p8)
}
  0x27   : > { %s614_s8 = smov 128   ;;  %s615_s9 = smov 8  }
  0x28   : > { %432 = dma.hbm_to_vmem [thread:$0]  (!%p692_p11), %s841_s1, 512, %s685_s22, [#allocation6], %s614_s8, %s614_s8, %s615_s9  }
  0x29   : > { %p25_p2 = scmp.eq.s32.totalorder %s24_s26, 0  ;;  %p34_p1 = scmp.ne.s32.totalorder %s607_s14, %s603_s13 }
  0x2a   : > { %p35_p4 = scmp.eq.s32.totalorder %s611_s15, 0  ;;  %p442_p6 = scmp.lt.s32.totalorder %s611_s15, 2 }
  0x2b   : > { %s728_s17 = scalar_select %p25_p2, %s607_s14, %s27_s25  }
  0x2c   : > { %p36_p8 = por %p35_p4, %p34_p1  ;;  %p851_p10 = scmp.eq.s32.totalorder %s662_s16, 1 }
  0x2d   : > { %s148_s27 = sand.u32 1, %s607_s14   ;;  %s388_s28 = sshll.u32 %s611_s15, 7 }
  0x2e   : > { %p732_p12 = por %p851_p10, %p34_p1  ;;  %s387_s29 = sshll.u32 %s148_s27, 3 }
  0x2f   : > { %s741_s4 = scalar_lea.hbm %s840_s0, %s388_s28  ;;  %s152_s22 = scalar_lea.vmem [#allocation2], %s387_s29 }
  0x30   : > { %s159_s25 = sshll.u32 %s152_s22, 4  ;;  %p743_p11 = pnand %p442_p6, %p36_p8  ;;  %s747_s25 = int_to_ptr.vmem [resolvable:$true] %s159_s25 }
  0x31   : > { %s149_s5 = scalar_lea.sflag [#allocation3], %s148_s27  ;;  %s511_s6 = scalar_lea.hbm %s741_s4, 128 }
  0x32   : > { %p512_p13 = scmp.ne.s32.totalorder %s741_s4, %s511_s6  ;;  %p513_p0 = pneg %p743_p11 }
  0x33   : > { %s516_s9 = scalar_lea.hbm %s840_s0, 256  ;;  %p517_p7 = scmp.lt.u32.totalorder %s741_s4, %s840_s0 }
  0x34   : > { %p514_p3 = pnand %p513_p0, %p512_p13  ;;  %p518_p9 = scmp.lt.u32.totalorder %s516_s9, %s511_s6 }
  0x35   : > { %p520_p1 = scmp.lt.u32.totalorder %s511_s6, %s741_s4 }
  0x36   : > { %p515_p5 = pneg %p514_p3  ;;  %p519_p2 = por %p518_p9, %p517_p7 }
  0x38   : > { %p521_p4 = por %p520_p1, %p519_p2 }
  0x3a   : > { %p522_p6 = pnand %p521_p4, %p515_p5 }
  0x3c   : > { %525 = shalt.err (!%p522_p6)
}
  0x3d   : > { %s526_s27 = scalar_lea.vmem %s747_s25, 128  ;;  %s616_s28 = smov [#allocation2]  }
  0x3e   : > { %p527_p8 = scmp.ne.s32.totalorder %s747_s25, %s526_s27  ;;  %s531_s29 = sshll.u32 %s616_s28, 4  ;;  %s532_s29 = int_to_ptr.vmem [resolvable:$false] %s531_s29 }
  0x3f   : > { %s533_s23 = scalar_lea.vmem %s532_s29, 256  ;;  %p534_p3 = scmp.lt.s32.totalorder %s747_s25, %s532_s29 }
  0x40   : > { %p529_p10 = pnand %p527_p8, %p513_p0  ;;  %p535_p7 = scmp.lt.s32.totalorder %s533_s23, %s526_s27 }
  0x42   : > { %p530_p13 = pneg %p529_p10  ;;  %p536_p9 = por %p535_p7, %p534_p3 }
  0x44   : > { %p537_p2 = pnand %p536_p9, %p530_p13 }
  0x46   : > { %540 = shalt.err (!%p537_p2)
}
  0x47   : > { %436 = dma.hbm_to_vmem [thread:$0]  (!%p743_p11), %s741_s4, 128, %s747_s25, %s149_s5  }
  0x48   : > { %p854_p5 = scmp.ne.s32.totalorder %s849_s20, 0 }
  0x49   : > { %s777_s30 = sand.u32 (!%p854_p5), 1, %s603_s13   ;;  %p855_p0 = scmp.ne.s32.totalorder (!%p854_p5), %s847_s18, 0 }
  0x4a   : > { %168 = sbr.rel (%p854_p5) target bundleno = 325 (0x145), region = 32  ;;  %s390_s22 = sshll.u32 (!%p854_p5), %s777_s30, 3 }
  0x4b   : > { %s171_s6 = scalar_lea.sflag (!%p854_p5), [#allocation3], %s777_s30  ;;  %s174_s7 = scalar_lea.vmem (!%p854_p5), [#allocation2], %s390_s22 }
  0x51   : > { %586 = dma.done.wait (%p855_p0), %s171_s6, 128  }
  0x52   : > { %588 = vsyncadd (%p855_p0), %s171_s6, 4294967168  ;;  %p856_p1 = scmp.eq.s32.totalorder %s662_s16, 0 }
  0x54   : > { %590 = dma.done.wait (%p856_p1), [#allocation6], 512   ;;  %p857_p11 = pmov %p856_p1 }
  0x55   : > { %v617_v0 = vmov 0.0|0.0   ;;  %vm618_vm0 = vmmov 0   ;;  %v619_v1 = vmov 0.0   ;;  %v202_v2 = vld [vmem:[#allocation5] sm:$0xff]  ;;  %v203_v3 = vld [vmem:[#allocation5 + $0x8] sm:$0xff]  ;;  %v204_v4 = vld [vmem:[#allocation5 + $0x10] sm:$0xff] }
  0x56   : > { %592 = vsyncadd (%p857_p11), [#allocation6], 4294966784  ;;  %415 = vmatprep.subr.bf16.mxu0 %v617_v0  ;;  %412 = vmatprep.mubr.msk.f32.mxu0 %vm618_vm0, %v619_v1  ;;  %v416_v5 = vpack.c.bf16 %v203_v3, %v202_v2  ;;  %v205_v6 = vld [vmem:[#allocation5 + $0x18] sm:$0xff]  ;;  %vm213_vm1 = vcmask 261120   ;;  %v393_v9 = vld [vmem:[%s842_s2] ss:$0 sm:$0xff] }
  0x57   : > { %v419_v7 = vpack.c.bf16 %v205_v6, %v204_v4  ;;  %v201_v8 = vld [vmem:[%s174_s7] sm:$0xff]  ;;  %s396_s4 = sshll.u32 %s662_s16, 7  ;;  %s200_s25 = scalar_lea.vmem [#allocation7], %s390_s22 }
  0x58   : > { %417 = vmatpush3.bf16.msra.mxu0 %v416_v5  ;;  %s303_s26 = sshll.u32 %s200_s25, 4  ;;  %s796_s9 = scalar_lea.hbm %s843_s3, %s396_s4  ;;  %s798_s26 = int_to_ptr.vmem [resolvable:$true] %s303_s26 }
  0x59   : > { %418 = vmatprep.subr.bf16.mxu0 %v617_v0  ;;  %s290_s10 = scalar_lea.sflag [#allocation4], %s777_s30  ;;  %s541_s11 = scalar_lea.vmem %s798_s26, 128 }
  0x5a   : > { %p542_p4 = scmp.ne.s32.totalorder %s798_s26, %s541_s11  ;;  %s620_s16 = smov [#allocation7]  }
  0x5b   : > { %s545_s27 = sshll.u32 %s620_s16, 4  ;;  %s546_s27 = int_to_ptr.vmem [resolvable:$false] %s545_s27 }
  0x5c   : > { %420 = vmatpush3.bf16.msra.mxu0 %v419_v7  ;;  %p543_p6 = pnand %p542_p4, %p732_p12  ;;  %s547_s28 = scalar_lea.vmem %s546_s27, 256 }
  0x5d   : > { %p548_p10 = scmp.lt.s32.totalorder %s798_s26, %s546_s27  ;;  %p549_p13 = scmp.lt.s32.totalorder %s547_s28, %s541_s11 }
  0x5e   : > { %p544_p8 = pneg %p543_p6 }
  0x5f   : > { %413 = vmatmul.mubr.msk.f32.vlgmr.msra.gmra.mrb[0].mxu0 %vm213_vm1, %v201_v8  ;;  %p550_p3 = por %p549_p13, %p548_p10 }
  0x61   : > { %p551_p7 = pnand %p550_p3, %p544_p8 }
 0x132   : > { %v283_v10 = vpop.f32.mrb[0].mxu0 }
 0x133   : > { %v284_v11 = vadd.f32 %v393_v9, %v283_v10  ;;  %v414_v12 = vpop.f32.mrb[1].mxu0 }
 0x135   : > { %v287_v13 = vadd.f32 %v284_v11, %v201_v8 }
 0x137   : > { %288 = vst.msk [vmem:[%s200_s25] sm:$0xff] %vm213_vm1, %v287_v13 }
 0x138   : > { %554 = shalt.err (!%p551_p7)
}
 0x139   : > { %s555_s29 = scalar_lea.hbm %s796_s9, 128  ;;  %s559_s22 = scalar_lea.hbm %s843_s3, 256 }
 0x13a   : > { %p556_p9 = scmp.ne.s32.totalorder %s796_s9, %s555_s29  ;;  %p560_p0 = scmp.lt.u32.totalorder %s796_s9, %s843_s3 }
 0x13b   : > { %p561_p1 = scmp.lt.u32.totalorder %s559_s22, %s555_s29  ;;  %p563_p4 = scmp.lt.u32.totalorder %s555_s29, %s796_s9 }
 0x13c   : > { %p557_p2 = pnand %p556_p9, %p732_p12 }
 0x13d   : > { %p562_p11 = por %p561_p1, %p560_p0 }
 0x13e   : > { %p558_p5 = pneg %p557_p2 }
 0x13f   : > { %p564_p6 = por %p563_p4, %p562_p11 }
 0x141   : > { %p565_p8 = pnand %p564_p6, %p558_p5 }
 0x143   : > { %568 = shalt.err (!%p565_p8)
}
 0x144   : > { %427 = dma.vmem_to_hbm [thread:$0]  (%p732_p12), %s798_s26, 128, %s796_s9, %s290_s10  }
 0x145 PF: > { %s315_s18 = sand.u32 1, %s599_s12   ;;  %p858_p10 = scmp.ne.s32.totalorder %s848_s19, 0 }
 0x146   : > { %p859_p13 = scmp.ge.s32.totalorder %s611_s15, 2  ;;  %s316_s20 = scalar_lea.sflag [#allocation4], %s315_s18 }
 0x148   : > { %p438_p3 = pnand %p859_p13, %p858_p10 }
 0x14a   : > { %594 = dma.done.wait (!%p438_p3), %s316_s20, 128  }
 0x14b   : > { %596 = vsyncadd (!%p438_p3), %s316_s20, 4294967168  ;;  %p17_p7 = scmp.ge.s32.totalorder %s697_s24, 4   ;;  %s860_s12 = smov %s603_s13 }
 0x14c   : > { %s861_s13 = smov %s607_s14  ;;  %s862_s14 = smov %s728_s17 }
 0x14d   : > { %s863_s15 = smov %s697_s24  ;;  %19 = sbr.rel (!%p17_p7) target bundleno = 6 (0x6), region = 81 }
 0x154   :  { %321 = vsyncpa [#allocation3], 1 }
 0x155   :  { %323 = vsyncpa [#allocation3 + $0x1], 1 }
 0x156   :  { %324 = vsyncpa [#allocation6], 1 }
 0x157   :  { %325 = vsyncpa [#allocation4], 1 }
 0x158   :  { %327 = vsyncpa [#allocation4 + $0x1], 1 }

</bundles_post_ra>
